<compile_context>
chip_gen: v5e
topology: v5e:2x2
jax: 0.10.0
libtpu: 0.0.40
codegen_flags: <defaults>
</compile_context>

<pallas_src>
import jax
import jax.numpy as jnp
from jax.experimental import pallas as pl
from jax.experimental.pallas import tpu as pltpu

_LANE = 128  # lane-dense trailing block width (multiple of 128)


def _relu_kernel(x_ref, o_ref):
    # Pure elementwise max(x, 0) on the current (block_rows, 128) VMEM tile.
    # 0 is weakly typed, so the input dtype is preserved.
    o_ref[...] = jnp.maximum(x_ref[...], 0)


def _chip_config():
    """Per-generation (block_bytes_per_buffer, vmem_limit_bytes, min_grid_steps)."""
    try:
        kind = jax.devices()[0].device_kind.lower()
    except Exception:
        kind = ""
    if "v7" in kind:
        # v7x: 64 MiB physical VMEM, 3.2 TB/s HBM, 2 TensorCores.
        # 4 MiB blocks -> 16 MiB double-buffered in+out working set.
        return 4 * 1024 * 1024, 32 * 1024 * 1024, 4
    if "v5" in kind or "v6" in kind:
        # v5e/v6e: 128 MiB physical VMEM. 8 MiB blocks -> 32 MiB working set,
        # comfortably under a raised 64 MiB scoped limit.
        return 8 * 1024 * 1024, 64 * 1024 * 1024, 1
    # Unknown chip: conservative settings that fit every generation.
    return 4 * 1024 * 1024, 32 * 1024 * 1024, 1


def relu_pallas(x, *, donate=False):
    """Elementwise ReLU via Pallas. Accepts any shape / numeric dtype."""
    orig_shape = x.shape
    n = x.size
    if n == 0:
        return x

    block_bytes, vmem_limit, min_grid_steps = _chip_config()
    itemsize = jnp.dtype(x.dtype).itemsize
    sub = max(8, 32 // itemsize)  # sublane pack: 8 (f32), 16 (bf16), 32 (int8)

    rows = pl.cdiv(n, _LANE)
    padded_n = rows * _LANE

    flat = x.reshape(-1)  # contiguous reshape: free
    if padded_n != n:
        # Only hit when numel is not a multiple of 128; costs one extra copy.
        flat = jnp.pad(flat, (0, padded_n - n))
    x2 = flat.reshape(rows, _LANE)

    # Dtype-scaled block: constant bytes per buffer regardless of dtype.
    block_rows = max(sub, block_bytes // (itemsize * _LANE))

    # v7x: keep >= min_grid_steps grid steps for mid-size arrays so both
    # TensorCores get >= 2 pipelined steps each.
    if min_grid_steps > 1 and rows >= min_grid_steps * 1024:
        per_step = max(sub, (pl.cdiv(rows, min_grid_steps) // sub) * sub)
        block_rows = min(block_rows, per_step)

    if rows <= block_rows:
        # Single block: block_shape equal to the full array dim is always legal.
        block_rows = rows
    grid = pl.cdiv(rows, block_rows)  # ragged final block is masked by Pallas

    spec = pl.BlockSpec((block_rows, _LANE), lambda i: (i, 0))

    out2 = pl.pallas_call(
        _relu_kernel,
        out_shape=jax.ShapeDtypeStruct((rows, _LANE), x.dtype),
        grid_spec=pltpu.PrefetchScalarGridSpec(
            num_scalar_prefetch=0,
            grid=(grid,),
            in_specs=[spec],
            out_specs=spec,
        ),
        # In-place write when the caller donates x: avoids allocating a second
        # full-size HBM buffer (read+write traffic is identical either way).
        input_output_aliases=({0: 0} if donate else {}),
        compiler_params=pltpu.CompilerParams(
            # One parallel axis: sharded across TensorCores on v7x, no-op on
            # v5e/v6e (single TC).
            dimension_semantics=("parallel",),
            vmem_limit_bytes=vmem_limit,
        ),
    )(x2)

    out_flat = out2.reshape(-1)
    if padded_n != n:
        out_flat = out_flat[:n]
    return out_flat.reshape(orig_shape)


if __name__ == "__main__":
    key = jax.random.PRNGKey(0)
    x = jax.random.normal(key, (2, 4, 16, 16), dtype=jnp.float32)

    out = relu_pallas(x)
    out = jax.block_until_ready(out)

    ref = jnp.maximum(x, 0.0)
    assert out.shape == x.shape
    assert out.dtype == x.dtype
    assert jnp.allclose(out, ref, atol=0.0, rtol=0.0)

    # Also exercise a shape whose row count does not divide the block size
    # (ragged final grid block) and a non-multiple-of-128 numel (pad path).
    x2 = jax.random.normal(jax.random.PRNGKey(1), (3, 5, 7, 11), dtype=jnp.float32)
    out2 = jax.block_until_ready(relu_pallas(x2))
    assert jnp.allclose(out2, jnp.maximum(x2, 0.0), atol=0.0, rtol=0.0)

    print("KERNEL_OK")
</pallas_src>

<mosaic_0001>
module attributes {stable_mosaic.version = 11 : i64} {
  func.func @_relu_kernel(%arg0: i32, %arg1: memref<16x128xf32, #tpu.memory_space<vmem>>, %arg2: memref<16x128xf32, #tpu.memory_space<vmem>>) attributes {dimension_semantics = [#tpu.dimension_semantics<parallel>], iteration_bounds = array<i64: 1>, scalar_prefetch = 0 : i64, scratch_operands = 0 : i64, tpu.core_type = #tpu.core_type<tc>, window_params = [{transform_indices = @transform_0, window_bounds = array<i64: 16, 128>}, {transform_indices = @transform_1, window_bounds = array<i64: 16, 128>}]} {
    %c0 = arith.constant 0 : index
    %c0_0 = arith.constant 0 : index
    %0 = vector.load %arg1[%c0, %c0_0] : memref<16x128xf32, #tpu.memory_space<vmem>>, vector<16x128xf32>
    %cst = arith.constant 0.000000e+00 : f32
    %1 = vector.broadcast %cst : f32 to vector<16x128xf32>
    %2 = arith.maximumf %0, %1 : vector<16x128xf32>
    %c0_1 = arith.constant 0 : index
    %c0_2 = arith.constant 0 : index
    %3 = vector.load %arg2[%c0_1, %c0_2] : memref<16x128xf32, #tpu.memory_space<vmem>>, vector<16x128xf32>
    tpu.vector_store %arg2[%c0_1, %c0_2], %2 {strides = array<i32>} : memref<16x128xf32, #tpu.memory_space<vmem>>, vector<16x128xf32>,
    return
  }
  func.func @transform_0(%arg0: i32) -> (i32, i32) {
    %c0_i32 = arith.constant 0 : i32
    %c0_i32_0 = arith.constant 0 : i32
    return %arg0, %c0_i32 : i32, i32
  }
  func.func @transform_1(%arg0: i32) -> (i32, i32) {
    %c0_i32 = arith.constant 0 : i32
    %c0_i32_0 = arith.constant 0 : i32
    return %arg0, %c0_i32 : i32, i32
  }
}

</mosaic_0001>

<bundles_post_ra>
// kernel: tpu_custom_call.1
= control target key start
LH: loop header
LB: loop body
LE: loop exit
PB: predicated region body
PF: predicated region fallthrough
CT: control target
= control target key end

     0   :  { %6 = vsyncpa [#allocation3], 0  ;;  %s126_s0 = inlined_call_operand.hbm [shape: f32[16,128], index: 0, kind: input, shape index: {}]   ;;  %s127_s1 = inlined_call_operand.hbm [shape: f32[16,128], index: 1, kind: output, shape index: {}]  }
   0x1   :  { %7 = vsyncpa [#allocation4], 0  ;;  %s12_s8 = sshll.u32 %s126_s0, 4  ;;  %s106_s9 = smov [#allocation2]   ;;  %s13_s8 = int_to_ptr.hbm [resolvable:$true] %s12_s8 }
   0x2   :  { %s14_s10 = sshll.u32 %s106_s9, 4  ;;  %s107_s11 = smov 128   ;;  %s15_s10 = int_to_ptr.vmem [resolvable:$true] %s14_s10 }
   0x3   :  { %s108_s12 = smov 8  }
   0x4   :  { %20 = dma.hbm_to_vmem [thread:$0]  %s13_s8, 256, %s15_s10, [#allocation3], %s107_s11, %s107_s11, %s108_s12  }
   0x5   :  { %102 = dma.done.wait [#allocation3], 256  }
   0x6   :  { %103 = vsyncadd [#allocation3], 4294967040  ;;  %s109_s13 = smov [#allocation5]   ;;  %s37_s17 = sshll.u32 %s127_s1, 4  ;;  %v25_v0 = vld [vmem:[#allocation2] sm:$0xff]  ;;  %v26_v1 = vld [vmem:[#allocation2 + $0x8] sm:$0xff]  ;;  %s38_s17 = int_to_ptr.hbm [resolvable:$true] %s37_s17 }
   0x7   :  { %s35_s14 = sshll.u32 %s109_s13, 4  ;;  %v27_v2 = vmax.f32 %v25_v0, 0.0  ;;  %v28_v3 = vmax.f32 %v26_v1, 0.0  ;;  %s36_s14 = int_to_ptr.vmem [resolvable:$true] %s35_s14 }
   0x9   :  { %29 = vst [vmem:[#allocation5] sm:$0xff] %v27_v2 }
   0xa   :  { %30 = vst [vmem:[#allocation5 + $0x8] sm:$0xff] %v28_v3 }
   0xb   :  { %43 = dma.vmem_to_hbm [thread:$0]  %s36_s14, 256, %s38_s17, [#allocation4], %s107_s11, %s107_s11, %s108_s12  }
   0xc   :  { %104 = dma.done.wait [#allocation4], 256  }
   0xd   :  { %105 = vsyncadd [#allocation4], 4294967040 }
   0xe   :  { %48 = vsyncpa [#allocation3], 1 }
   0xf   :  { %49 = vsyncpa [#allocation4], 1 }

</bundles_post_ra>
